<compile_context>
chip_gen: v7x
topology: tpu7x:2x2x1
jax: 0.10.0
libtpu: 0.0.40
codegen_flags: <defaults>
</compile_context>

<pallas_src>
import functools

import jax
import jax.numpy as jnp
from jax import lax
from jax.experimental import pallas as pl
from jax.experimental.pallas import tpu as pltpu

GEM_P = 3.0      # gem(x, p=3)
GEM_EPS = 1e-6   # gem eps
IN_EPS = 1e-5    # nn.InstanceNorm2d default eps
LANE = 128


# ------------------------------ small helpers -------------------------------

def _round_up(n, m):
    return ((n + m - 1) // m) * m


def _tpu_defaults():
    """Per-generation tile / VMEM-limit defaults."""
    try:
        kind = jax.devices()[0].device_kind.lower()
    except Exception:  # pragma: no cover
        kind = ""
    if "v7" in kind:
        # 64 MiB VMEM per TC: smaller DMA tile, tighter scoped limit.
        return {"s_chunk_target": 128, "vmem_limit": 40 * 1024 * 1024}
    if "v6" in kind or "v5" in kind:
        # 128 MiB VMEM: big tiles to sit at the HBM roofline.
        return {"s_chunk_target": 512, "vmem_limit": 64 * 1024 * 1024}
    return {"s_chunk_target": 256, "vmem_limit": 48 * 1024 * 1024}


def _pick_s_chunk(S, target):
    """Largest divisor of S <= target, preferring multiples of 16 (bf16 sublanes)."""
    if S <= target:
        return S
    for step in (16, 8):
        best = None
        for d in range(step, target + 1, step):
            if S % d == 0:
                best = d
        if best is not None:
            return best
    return S


def _pick_sub_rows(s_chunk, target=32):
    """Row sub-slice for the in-kernel f32 strip; divisor of s_chunk, multiple of 8."""
    if s_chunk <= target:
        half = s_chunk // 2
        if half >= 8 and half % 8 == 0 and s_chunk % half == 0:
            return half
        return s_chunk
    best = None
    for d in range(8, target + 1, 8):
        if s_chunk % d == 0:
            best = d
    return best if best is not None else s_chunk


def _pick_b_blk(B):
    """Batch block: full batch if small, else 8 (>=2 blocks when B >= 16, megacore)."""
    if B <= 8:
        return B
    return 8 if B % 8 == 0 else B


def _compiler_params(vmem_limit):
    return pltpu.CompilerParams(
        dimension_semantics=("parallel", "arbitrary"),
        vmem_limit_bytes=vmem_limit,
    )


# --------------------------------- kernels ----------------------------------

def student_head_kernel(x_ref, feat_ref, acc_ref, *, sub_rows):
    # CrossModality_Student (post-backbone): gem -> flatten (classifier runs elsewhere).
    s = pl.program_id(1)

    @pl.when(s == 0)
    def _():
        acc_ref[...] = jnp.zeros_like(acc_ref)

    b_blk, s_chunk, C = x_ref.shape
    n_sub = s_chunk // sub_rows

    def body(j, carry):
        start = pl.multiple_of(j * sub_rows, sub_rows)
        x = x_ref[:, pl.ds(start, sub_rows), :].astype(jnp.float32)  # thin f32 strip
        xc = jnp.maximum(x, GEM_EPS)
        acc_ref[...] += jnp.sum(xc * xc * xc, axis=1)                # partial GeM (p=3)
        return carry

    lax.fori_loop(0, n_sub, body, 0, unroll=True)

    @pl.when(s == pl.num_programs(1) - 1)
    def _():
        pooled = acc_ref[...] / (s_chunk * pl.num_programs(1))       # spatial mean > 0
        feat_ref[...] = jnp.exp(jnp.log(pooled) / GEM_P)             # ^(1/p) via EUP


def teacher_head_kernel(x_ref, scale_ref, shift_ref, w1_ref, b1_ref, w2_ref,
                        feat_ref, acc_ref, *, sub_rows):
    # RGB_Teacher / IR_Teacher (post-backbone), eval mode:
    #   x_IN = InstanceNorm2d(x)     (running stats + affine -> fused scale/shift)
    #   m    = sigmoid(conv1x1(relu(conv1x1(x_IN))))   (1x1 convs == channel matmuls,
    #          with the IN affine pre-folded into conv1: h = relu(x @ w1' + b1))
    #   gem(x_IN * m)
    s = pl.program_id(1)

    @pl.when(s == 0)
    def _():
        acc_ref[...] = jnp.zeros_like(acc_ref)

    scale = scale_ref[...][:, None, :]      # (1,1,C) f32 — hoisted out of the loop
    shift = shift_ref[...][:, None, :]
    b1 = b1_ref[...]                        # (1, cr) f32
    w1 = w1_ref[...]                        # (C, cr) bf16, IN scale pre-folded
    w2 = w2_ref[...]                        # (cr, C) bf16

    b_blk, s_chunk, C = x_ref.shape
    n_sub = s_chunk // sub_rows

    def body(j, carry):
        start = pl.multiple_of(j * sub_rows, sub_rows)
        x_bf = x_ref[:, pl.ds(start, sub_rows), :]                   # bf16 strip
        x_flat = x_bf.reshape(b_blk * sub_rows, C)
        # Mask: MXU consumes the DMA'd bf16 tile directly (IN folded into w1/b1).
        h = jnp.maximum(
            jnp.dot(x_flat, w1, preferred_element_type=jnp.float32) + b1, 0.0)
        m = jax.nn.sigmoid(
            jnp.dot(h.astype(jnp.bfloat16), w2, preferred_element_type=jnp.float32))
        # Gating / GeM path needs x_IN in f32 — only for this thin strip.
        x_in = x_bf.astype(jnp.float32) * scale + shift
        xg = x_in * m.reshape(b_blk, sub_rows, C)
        xc = jnp.maximum(xg, GEM_EPS)
        acc_ref[...] += jnp.sum(xc * xc * xc, axis=1)                # partial GeM (p=3)
        return carry

    lax.fori_loop(0, n_sub, body, 0, unroll=True)

    @pl.when(s == pl.num_programs(1) - 1)
    def _():
        pooled = acc_ref[...] / (s_chunk * pl.num_programs(1))
        feat_ref[...] = jnp.exp(jnp.log(pooled) / GEM_P)


def classifier_kernel(feat_ref, wc_ref, logit_ref):
    # Linear(no bias) over the full batch: bf16 inputs, f32 accumulation.
    logit_ref[...] = jnp.dot(feat_ref[...].astype(jnp.bfloat16), wc_ref[...],
                             preferred_element_type=jnp.float32)


# -------------------------------- wrappers -----------------------------------

def student_head(x_nhwc, *, s_chunk_target=None):
    cfg = _tpu_defaults()
    if s_chunk_target is None:
        s_chunk_target = cfg["s_chunk_target"]
    B, H, W, C = x_nhwc.shape
    S = H * W
    x = x_nhwc.reshape(B, S, C)                      # contiguous reshape — no transpose
    b_blk = _pick_b_blk(B)
    s_chunk = _pick_s_chunk(S, s_chunk_target)
    sub_rows = _pick_sub_rows(s_chunk)
    grid = (B // b_blk, S // s_chunk)

    feat = pl.pallas_call(
        functools.partial(student_head_kernel, sub_rows=sub_rows),
        out_shape=jax.ShapeDtypeStruct((B, C), jnp.float32),
        grid_spec=pltpu.PrefetchScalarGridSpec(
            num_scalar_prefetch=0,
            grid=grid,
            in_specs=[pl.BlockSpec((b_blk, s_chunk, C), lambda b, s: (b, s, 0))],
            out_specs=pl.BlockSpec((b_blk, C), lambda b, s: (b, 0)),
            scratch_shapes=[pltpu.VMEM((b_blk, C), jnp.float32)],
        ),
        compiler_params=_compiler_params(cfg["vmem_limit"]),
    )(x)
    return feat


def teacher_head(x_nhwc, p, *, s_chunk_target=None):
    cfg = _tpu_defaults()
    if s_chunk_target is None:
        s_chunk_target = cfg["s_chunk_target"]
    B, H, W, C = x_nhwc.shape
    S = H * W
    x = x_nhwc.reshape(B, S, C)                      # contiguous reshape — no transpose
    cr = p["w1f_t"].shape[1]
    b_blk = _pick_b_blk(B)
    s_chunk = _pick_s_chunk(S, s_chunk_target)
    sub_rows = _pick_sub_rows(s_chunk)
    grid = (B // b_blk, S // s_chunk)

    feat = pl.pallas_call(
        functools.partial(teacher_head_kernel, sub_rows=sub_rows),
        out_shape=jax.ShapeDtypeStruct((B, C), jnp.float32),
        grid_spec=pltpu.PrefetchScalarGridSpec(
            num_scalar_prefetch=0,
            grid=grid,
            in_specs=[
                pl.BlockSpec((b_blk, s_chunk, C), lambda b, s: (b, s, 0)),
                pl.BlockSpec((1, C), lambda b, s: (0, 0)),          # IN scale (gating)
                pl.BlockSpec((1, C), lambda b, s: (0, 0)),          # IN shift (gating)
                pl.BlockSpec((C, cr), lambda b, s: (0, 0)),         # folded mask conv1
                pl.BlockSpec((1, cr), lambda b, s: (0, 0)),         # folded conv1 bias
                pl.BlockSpec((cr, C), lambda b, s: (0, 0)),         # mask conv2
            ],
            out_specs=pl.BlockSpec((b_blk, C), lambda b, s: (b, 0)),
            scratch_shapes=[pltpu.VMEM((b_blk, C), jnp.float32)],
        ),
        compiler_params=_compiler_params(cfg["vmem_limit"]),
    )(x, p["in_scale"], p["in_shift"], p["w1f_t"], p["b1"], p["w2_t"])
    return feat


def classifier_head(feat, wc_t, num_classes):
    B, C = feat.shape
    ncls_pad = wc_t.shape[1]
    logit_pad = pl.pallas_call(
        classifier_kernel,
        out_shape=jax.ShapeDtypeStruct((B, ncls_pad), jnp.float32),
        grid_spec=pltpu.PrefetchScalarGridSpec(
            num_scalar_prefetch=0,
            grid=(1,),
            in_specs=[pl.BlockSpec((B, C), lambda i: (0, 0)),
                      pl.BlockSpec((C, ncls_pad), lambda i: (0, 0))],
            out_specs=pl.BlockSpec((B, ncls_pad), lambda i: (0, 0)),
        ),
        compiler_params=pltpu.CompilerParams(dimension_semantics=("arbitrary",)),
    )(feat, wc_t)
    return logit_pad[:, :num_classes]


def net_forward(params, total_input, rgb_input, ir_input,
                rgb_test=False, ir_test=False, s_chunk_target=None):
    """Eval-mode Net.forward (self.training == False). Inputs are channels-last
    backbone feature maps (B, H, W, C)."""
    feat_student = student_head(total_input, s_chunk_target=s_chunk_target)
    logit_student = classifier_head(feat_student, params["student_wc_t"],
                                    params["num_classes"])
    if rgb_test or ir_test:
        teacher = params["rgb_teacher"] if rgb_test else params["ir_teacher"]
        # Two independent teacher calls — NO jnp.concatenate (that would write a
        # brand-new 2*B*S*C buffer to HBM on a bandwidth-bound path).  Teacher
        # logits are discarded by the PyTorch eval branch, so they are not computed.
        feat_q = teacher_head(rgb_input, teacher, s_chunk_target=s_chunk_target)
        feat_g = teacher_head(ir_input, teacher, s_chunk_target=s_chunk_target)
        return logit_student, feat_student, feat_q, feat_g
    return logit_student, feat_student


# --------------------------- deterministic params ----------------------------

def init_teacher_params(key, C, r, num_classes):
    k = jax.random.split(key, 7)
    sc = 0.02
    ncls_pad = _round_up(num_classes, LANE)
    run_mean = sc * jax.random.normal(k[0], (1, C), dtype=jnp.float32)
    run_var = 0.5 + 0.5 * jax.random.uniform(k[1], (1, C), dtype=jnp.float32)
    gamma = 1.0 + sc * jax.random.normal(k[2], (1, C), dtype=jnp.float32)
    beta = sc * jax.random.normal(k[3], (1, C), dtype=jnp.float32)
    # Eval-mode InstanceNorm2d(track_running_stats=True, affine=True) folds to a
    # single per-channel scale/shift.
    in_scale = gamma * jax.lax.rsqrt(run_var + IN_EPS)
    in_shift = beta - run_mean * in_scale
    # PyTorch Conv2d weights are (out, in, 1, 1) / Linear is (out, in); stored transposed.
    w1 = sc * jax.random.normal(k[4], (C, C // r), dtype=jnp.float32)
    w2 = sc * jax.random.normal(k[5], (C // r, C), dtype=jnp.float32)
    wc = sc * jax.random.normal(k[6], (C, num_classes), dtype=jnp.float32)
    wc_pad = jnp.pad(wc, ((0, 0), (0, ncls_pad - num_classes)))
    # Fold the IN affine into the first mask conv:
    #   relu((x*scale + shift) @ w1) == relu(x @ (scale^T * w1) + shift @ w1)
    w1f = (in_scale.reshape(C, 1) * w1).astype(jnp.bfloat16)
    b1 = (in_shift @ w1).astype(jnp.float32)          # (1, cr)
    return {
        "in_scale": in_scale.astype(jnp.float32),
        "in_shift": in_shift.astype(jnp.float32),
        "w1_t": w1.astype(jnp.bfloat16),              # unfolded (reference only)
        "w1f_t": w1f,                                 # folded (kernel)
        "b1": b1,
        "w2_t": w2.astype(jnp.bfloat16),
        "wc_t": wc_pad.astype(jnp.bfloat16),          # unused in eval (logits discarded)
        "num_classes": num_classes,
    }


def init_params(key, C, r, num_classes):
    k_s, k_rgb, k_ir = jax.random.split(key, 3)
    ncls_pad = _round_up(num_classes, LANE)
    wc = 0.02 * jax.random.normal(k_s, (C, num_classes), dtype=jnp.float32)
    wc_pad = jnp.pad(wc, ((0, 0), (0, ncls_pad - num_classes)))
    return {
        "student_wc_t": wc_pad.astype(jnp.bfloat16),
        "num_classes": num_classes,
        "rgb_teacher": init_teacher_params(k_rgb, C, r, num_classes),
        "ir_teacher": init_teacher_params(k_ir, C, r, num_classes),
    }


# ---------------------------- pure-JAX references -----------------------------

def _gem_ref(x_bsc):
    xc = jnp.maximum(x_bsc.astype(jnp.float32), GEM_EPS)
    pooled = jnp.mean(xc ** GEM_P, axis=1)
    return pooled ** (1.0 / GEM_P)


def _student_ref(x_nhwc, wc_t, ncls):
    B, H, W, C = x_nhwc.shape
    feat = _gem_ref(x_nhwc.reshape(B, H * W, C))
    logit = jnp.dot(feat.astype(jnp.bfloat16).astype(jnp.float32),
                    wc_t.astype(jnp.float32))
    return feat, logit[:, :ncls]


def _teacher_ref(x_nhwc, p):
    B, H, W, C = x_nhwc.shape
    x = x_nhwc.reshape(B, H * W, C).astype(jnp.float32)
    x_in = x * p["in_scale"][:, None, :] + p["in_shift"][:, None, :]
    h = jnp.maximum(jnp.einsum("bsc,ck->bsk", x_in,
                               p["w1_t"].astype(jnp.float32)), 0.0)
    m = jax.nn.sigmoid(jnp.einsum("bsk,kc->bsc", h,
                                  p["w2_t"].astype(jnp.float32)))
    return _gem_ref(x_in * m)


# ----------------------------------- main -------------------------------------

if __name__ == "__main__":
    key = jax.random.PRNGKey(0)
    # Small shapes: C=256 stands in for the 2048 backbone channels; r=2 keeps
    # the bottleneck width at C//r = 128 (lane-dense, as at production scale).
    B, C, H, W = 2, 256, 8, 8
    num_classes, r = 16, 2

    k_p, k_t, k_r, k_i = jax.random.split(key, 4)
    params = init_params(k_p, C, r, num_classes)

    # Backbone feature maps, channels-last, bf16 on the wire.
    total_input = jax.random.normal(k_t, (B, H, W, C), dtype=jnp.float32).astype(jnp.bfloat16)
    rgb_input = jax.random.normal(k_r, (B, H, W, C), dtype=jnp.float32).astype(jnp.bfloat16)
    ir_input = jax.random.normal(k_i, (B, H, W, C), dtype=jnp.float32).astype(jnp.bfloat16)

    # s_chunk_target=32 forces 2 spatial grid steps (and 2 in-kernel row sub-slices)
    # so the accumulator + fori_loop paths are exercised.
    out = net_forward(params, total_input, rgb_input, ir_input,
                      rgb_test=True, s_chunk_target=32)
    out = jax.block_until_ready(out)
    logit_student, feat_student, feat_q, feat_g = out

    # Shape / finiteness checks.
    assert logit_student.shape == (B, num_classes)
    assert feat_student.shape == (B, C)
    assert feat_q.shape == (B, C) and feat_g.shape == (B, C)
    assert all(bool(jnp.all(jnp.isfinite(o))) for o in out)

    # Numerical check against a pure-JAX reference (bf16 matmul tolerance).
    feat_s_ref, logit_s_ref = _student_ref(total_input, params["student_wc_t"], num_classes)
    feat_q_ref = _teacher_ref(rgb_input, params["rgb_teacher"])
    feat_g_ref = _teacher_ref(ir_input, params["rgb_teacher"])
    assert jnp.allclose(feat_student, feat_s_ref, rtol=5e-2, atol=5e-2)
    assert jnp.allclose(logit_student, logit_s_ref, rtol=5e-2, atol=5e-2)
    assert jnp.allclose(feat_q, feat_q_ref, rtol=5e-2, atol=5e-2)
    assert jnp.allclose(feat_g, feat_g_ref, rtol=5e-2, atol=5e-2)

    print("KERNEL_OK")
</pallas_src>

<mosaic_0001>
module attributes {stable_mosaic.version = 11 : i64} {
  func.func @student_head_kernel(%arg0: i32, %arg1: i32, %arg2: memref<2x32x256xbf16, #tpu.memory_space<vmem>>, %arg3: memref<2x256xf32, #tpu.memory_space<vmem>>, %arg4: memref<2x256xf32, #tpu.memory_space<vmem>>) attributes {dimension_semantics = [#tpu.dimension_semantics<parallel>, #tpu.dimension_semantics<arbitrary>], iteration_bounds = array<i64: 1, 2>, scalar_prefetch = 0 : i64, scratch_operands = 1 : i64, tpu.core_type = #tpu.core_type<tc>, window_params = [{transform_indices = @transform_0, window_bounds = array<i64: 2, 32, 256>}, {transform_indices = @transform_1, window_bounds = array<i64: 2, 256>}]} {
    %c0_i32 = arith.constant 0 : i32
    %0 = arith.cmpi eq, %arg1, %c0_i32 : i32
    %1 = arith.extui %0 : i1 to i32
    %c0_i32_0 = arith.constant 0 : i32
    %2 = arith.cmpi ne, %1, %c0_i32_0 : i32
    scf.if %2 {
      %cst_19 = arith.constant 0.000000e+00 : f32
      %32 = vector.broadcast %cst_19 : f32 to vector<2x256xf32>
      %c0_20 = arith.constant 0 : index
      %c0_21 = arith.constant 0 : index
      %33 = vector.load %arg4[%c0_20, %c0_21] : memref<2x256xf32, #tpu.memory_space<vmem>>, vector<2x256xf32>
      tpu.vector_store %arg4[%c0_20, %c0_21], %32 {strides = array<i32>} : memref<2x256xf32, #tpu.memory_space<vmem>>, vector<2x256xf32>,
    } else {
    }
    %c0_i32_1 = arith.constant 0 : i32
    %c16_i32 = arith.constant 16 : i32
    %3 = arith.muli %c0_i32_1, %c16_i32 : i32
    %4 = tpu.assume_multiple %3, 16 : i32
    %c0 = arith.constant 0 : index
    %5 = arith.index_cast %4 : i32 to index
    %c0_2 = arith.constant 0 : index
    %6 = vector.load %arg2[%c0, %5, %c0_2] : memref<2x32x256xbf16, #tpu.memory_space<vmem>>, vector<2x16x256xbf16>
    %7 = arith.extf %6 : vector<2x16x256xbf16> to vector<2x16x256xf32>
    %cst = arith.constant 9.99999997E-7 : f32
    %8 = vector.broadcast %cst : f32 to vector<2x16x256xf32>
    %9 = arith.maximumf %7, %8 : vector<2x16x256xf32>
    %c0_3 = arith.constant 0 : index
    %c0_4 = arith.constant 0 : index
    %10 = vector.load %arg4[%c0_3, %c0_4] : memref<2x256xf32, #tpu.memory_space<vmem>>, vector<2x256xf32>
    %11 = arith.mulf %9, %9 : vector<2x16x256xf32>
    %12 = arith.mulf %11, %9 : vector<2x16x256xf32>
    %cst_5 = arith.constant dense<0.000000e+00> : vector<2x256xf32>
    %13 = vector.multi_reduction <add>, %12, %cst_5 [1] : vector<2x16x256xf32> to vector<2x256xf32>
    %14 = arith.addf %10, %13 : vector<2x256xf32>
    %c0_6 = arith.constant 0 : index
    %c0_7 = arith.constant 0 : index
    %15 = vector.load %arg4[%c0_6, %c0_7] : memref<2x256xf32, #tpu.memory_space<vmem>>, vector<2x256xf32>
    tpu.vector_store %arg4[%c0_6, %c0_7], %14 {strides = array<i32>} : memref<2x256xf32, #tpu.memory_space<vmem>>, vector<2x256xf32>,
    %c1_i32 = arith.constant 1 : i32
    %c16_i32_8 = arith.constant 16 : i32
    %16 = arith.muli %c1_i32, %c16_i32_8 : i32
    %17 = tpu.assume_multiple %16, 16 : i32
    %c0_9 = arith.constant 0 : index
    %18 = arith.index_cast %17 : i32 to index
    %c0_10 = arith.constant 0 : index
    %19 = vector.load %arg2[%c0_9, %18, %c0_10] : memref<2x32x256xbf16, #tpu.memory_space<vmem>>, vector<2x16x256xbf16>
    %20 = arith.extf %19 : vector<2x16x256xbf16> to vector<2x16x256xf32>
    %cst_11 = arith.constant 9.99999997E-7 : f32
    %21 = vector.broadcast %cst_11 : f32 to vector<2x16x256xf32>
    %22 = arith.maximumf %20, %21 : vector<2x16x256xf32>
    %c0_12 = arith.constant 0 : index
    %c0_13 = arith.constant 0 : index
    %23 = vector.load %arg4[%c0_12, %c0_13] : memref<2x256xf32, #tpu.memory_space<vmem>>, vector<2x256xf32>
    %24 = arith.mulf %22, %22 : vector<2x16x256xf32>
    %25 = arith.mulf %24, %22 : vector<2x16x256xf32>
    %cst_14 = arith.constant dense<0.000000e+00> : vector<2x256xf32>
    %26 = vector.multi_reduction <add>, %25, %cst_14 [1] : vector<2x16x256xf32> to vector<2x256xf32>
    %27 = arith.addf %23, %26 : vector<2x256xf32>
    %c0_15 = arith.constant 0 : index
    %c0_16 = arith.constant 0 : index
    %28 = vector.load %arg4[%c0_15, %c0_16] : memref<2x256xf32, #tpu.memory_space<vmem>>, vector<2x256xf32>
    tpu.vector_store %arg4[%c0_15, %c0_16], %27 {strides = array<i32>} : memref<2x256xf32, #tpu.memory_space<vmem>>, vector<2x256xf32>,
    %c2_i32 = arith.constant 2 : i32
    %c1_i32_17 = arith.constant 1 : i32
    %29 = arith.cmpi eq, %arg1, %c1_i32_17 : i32
    %30 = arith.extui %29 : i1 to i32
    %c0_i32_18 = arith.constant 0 : i32
    %31 = arith.cmpi ne, %30, %c0_i32_18 : i32
    scf.if %31 {
      %c0_19 = arith.constant 0 : index
      %c0_20 = arith.constant 0 : index
      %32 = vector.load %arg4[%c0_19, %c0_20] : memref<2x256xf32, #tpu.memory_space<vmem>>, vector<2x256xf32>
      %cst_21 = arith.constant 6.400000e+01 : f32
      %33 = vector.broadcast %cst_21 : f32 to vector<2x256xf32>
      %34 = arith.divf %32, %33 : vector<2x256xf32>
      %35 = math.log %34 : vector<2x256xf32>
      %cst_22 = arith.constant 3.000000e+00 : f32
      %36 = vector.broadcast %cst_22 : f32 to vector<2x256xf32>
      %37 = arith.divf %35, %36 : vector<2x256xf32>
      %38 = math.exp %37 : vector<2x256xf32>
      %c0_23 = arith.constant 0 : index
      %c0_24 = arith.constant 0 : index
      %39 = vector.load %arg3[%c0_23, %c0_24] : memref<2x256xf32, #tpu.memory_space<vmem>>, vector<2x256xf32>
      tpu.vector_store %arg3[%c0_23, %c0_24], %38 {strides = array<i32>} : memref<2x256xf32, #tpu.memory_space<vmem>>, vector<2x256xf32>,
    } else {
    }
    return
  }
  func.func @transform_0(%arg0: i32, %arg1: i32) -> (i32, i32, i32) {
    %c0_i32 = arith.constant 0 : i32
    %c0_i32_0 = arith.constant 0 : i32
    return %arg0, %arg1, %c0_i32 : i32, i32, i32
  }
  func.func @transform_1(%arg0: i32, %arg1: i32) -> (i32, i32) {
    %c0_i32 = arith.constant 0 : i32
    %c0_i32_0 = arith.constant 0 : i32
    return %arg0, %c0_i32 : i32, i32
  }
}

</mosaic_0001>

<bundles_post_ra>
// kernel: tpu_custom_call.1
= control target key start
LH: loop header
LB: loop body
LE: loop exit
PB: predicated region body
PF: predicated region fallthrough
CT: control target
= control target key end

     0   :  { %6 = vsyncpa [#allocation4], 0  ;;  %s822_s0 = inlined_call_operand.hbm [shape: bf16[2,64,256], index: 0, kind: input, shape index: {}]   ;;  %s823_s1 = inlined_call_operand.hbm [shape: f32[2,256], index: 1, kind: output, shape index: {}]  }
   0x1   :  { %8 = vsyncpa [#allocation4 + $0x1], 0 }
   0x2   :  { %9 = vsyncpa [#allocation5], 0  ;;  %s669_s6 = smov 0   ;;  %s671_s7 = smov 0  }
   0x3   :  { %s673_s8 = smov 0   ;;  %s675_s9 = smov 0  }
   0x4   :  { %s677_s10 = smov 0   ;;  %s679_s11 = smov 0  }
   0x5 LB: > { %s469_s12 = sadd.s32 4294967295, %s648_s11   ;;  %s24_s13 = sadd.s32 1, %s644_s10  ;;  %s648_s11 = sphi %s679_s11, %s15_s11   ;;  %s644_s10 = sphi %s677_s10, %s831_s10   ;;  %s640_s9 = sphi %s675_s9, %s830_s9   ;;  %s636_s8 = sphi %s673_s8, %s829_s8   ;;  %s632_s7 = sphi %s671_s7, %s828_s7   ;;  %s628_s6 = sphi %s669_s6, %s827_s6  }
   0x6   : > { %p25_p0 = scmp.ge.s32.totalorder %s24_s13, 2  ;;  %s36_s14 = sadd.s32 1, %s636_s8 }
   0x7   : > { %p43_p1 = scmp.ne.s32.totalorder %s636_s8, %s632_s7  ;;  %p44_p2 = scmp.eq.s32.totalorder %s648_s11, 0 }
   0x8   : > { %s833_s13 = smov (%p25_p0, %s24_s13), 0  ;;  %p49_p4 = scmp.ne.s32.totalorder %s632_s7, %s628_s6 }
   0x9   : > { %p705_p3 = por %p44_p2, %p43_p1  ;;  %s32_s16 = ssub.s32 %s644_s10, %s833_s13 }
   0xa   : > { %p50_p5 = scmp.eq.s32.totalorder %s469_s12, 0  ;;  %p34_p6 = scmp.eq.s32.totalorder %s32_s16, 0 }
   0xb   : > { %p471_p8 = scmp.ge.s32.totalorder %s648_s11, 2 }
   0xc   : > { %p714_p7 = por %p50_p5, %p49_p4 }
   0xd   : > { %s719_s18 = scalar_select %p34_p6, %s636_s8, %s36_s14  }
   0xe   : > { %95 = sbr.rel (%p471_p8) target bundleno = 34 (0x22), region = 16 }
  0x15   : > { %s99_s19 = sand.u32 1, %s636_s8   ;;  %s491_s20 = sshll.u32 %s644_s10, 9 }
  0x16   : > { %s472_s21 = sshll.u32 %s99_s19, 6  ;;  %s113_s24 = scalar_lea.hbm %s822_s0, %s491_s20 }
  0x17   : > { %s492_s25 = scalar_select %p705_p3, [#allocation0], [#allocation9] }
  0x18   : > { %s103_s26 = scalar_lea.vmem [#allocation3], %s472_s21  ;;  %s650_s29 = smov 1024  }
  0x19   : > { %s126_s27 = sshll.u32 %s103_s26, 4  ;;  %s118_s28 = sld [smem:[%s492_s25]]   ;;  %s127_s27 = int_to_ptr.vmem [resolvable:$true] %s126_s27 }
  0x1a   : > { %493 = sst [smem:[#allocation8]] (%p705_p3), %s650_s29  ;;  %s651_s30 = smov 512  }
  0x1b   : > { %494 = sst [smem:[#allocation8 + $0x1]] (%p705_p3), %s651_s30  ;;  %s652_s2 = smov 4  }
  0x1c   : > { %495 = sst [smem:[#allocation8 + $0x2]] (%p705_p3), %s652_s2  ;;  %s653_s3 = smov 128  }
  0x1d   : > { %496 = sst [smem:[#allocation8 + $0x3]] (%p705_p3), %s653_s3  ;;  %s654_s5 = smov 8  }
  0x1e   : > { %497 = sst [smem:[#allocation8 + $0x4]] (%p705_p3), %s653_s3  ;;  %s100_s14 = scalar_lea.sflag [#allocation4], %s99_s19 }
  0x1f   : > { %s476_s4 = sshll.u32 %s118_s28, 26  ;;  %498 = sst [smem:[#allocation8 + $0x5]] (%p705_p3), %s654_s5 }
  0x20   : > { %s477_s6 = sadd.s32 134217728, %s476_s4  ;;  %s655_s16 = smov [#allocation7]  }
  0x21   : > { %499 = dma.general (%p705_p3), %s113_s24, 1024, %s127_s27, %s100_s14, %s655_s16, [#allocation8], %s477_s6, 0  }
  0x22 PF: > { %p478_p9 = scmp.ge.s32.totalorder %s648_s11, 1  ;;  %p147_p10 = scmp.lt.s32.totalorder %s648_s11, 3 }
  0x24   : > { %p148_p11 = pnand %p478_p9, %p147_p10 }
  0x25   : > { %s153_s20 = sand.u32 (!%p148_p11), 1, %s632_s7  }
  0x26   : > { %151 = sbr.rel (%p148_p11) target bundleno = 172 (0xac), region = 24  ;;  %s479_s21 = sshll.u32 (!%p148_p11), %s153_s20, 6 }
  0x27   : > { %s154_s22 = scalar_lea.sflag (!%p148_p11), [#allocation4], %s153_s20  ;;  %s746_s23 = scalar_lea.vmem (!%p148_p11), [#allocation3], %s479_s21 }
  0x2d   : > { %619 = dma.done.wait (%p714_p7), %s154_s22, 1024  }
  0x2e   : > { %621 = vsyncadd (%p714_p7), %s154_s22, 4294966272  ;;  %p480_p12 = scmp.ne.s32.totalorder %s640_s9, 0 }
  0x2f   : > { %v656_v0 = vmov (!%p480_p12), 0.0  }
  0x30   : > { %176 = sbr.rel (%p480_p12) target bundleno = 55 (0x37), region = 32  ;;  %177 = vst [vmem:[#allocation2] sm:$0xf] (!%p480_p12), %v656_v0 }
  0x37 PF: > { %v181_v1 = vld [vmem:[%s746_s23] sm:$0xff]  ;;  %v182_v2 = vld [vmem:[%s746_s23 + $0x8] sm:$0xff]  ;;  %v254_v16 = vlaneseq  ;;  %v657_v20 = vmov 1983009808   ;;  %v481_v38 = vld [vmem:[%s746_s23 + $0x10] sm:$0xff]  ;;  %vm271_vm0 = vcmask 1041409  }
  0x38   : > { %v183_v3 = vld [vmem:[%s746_s23 + $0x20] sm:$0xff]  ;;  %v184_v4 = vld [vmem:[%s746_s23 + $0x28] sm:$0xff]  ;;  %v185_v5 = vunpack.c.l.bf16 %v181_v1  ;;  %v186_v6 = vunpack.c.h.bf16 %v181_v1  ;;  %v187_v7 = vunpack.c.l.bf16 %v182_v2  ;;  %v188_v8 = vunpack.c.h.bf16 %v182_v2  ;;  %v482_v43 = vld [vmem:[%s746_s23 + $0x18] sm:$0xff]  ;;  %p485_p13 = scmp.ne.s32.totalorder %s640_s9, 1 }
  0x39   : > { %v189_v9 = vunpack.c.l.bf16 %v183_v3  ;;  %v190_v10 = vunpack.c.h.bf16 %v183_v3  ;;  %v191_v11 = vunpack.c.l.bf16 %v184_v4  ;;  %v192_v12 = vunpack.c.h.bf16 %v184_v4  ;;  %v483_v46 = vld [vmem:[%s746_s23 + $0x30] sm:$0xff]  ;;  %v484_v50 = vld [vmem:[%s746_s23 + $0x38] sm:$0xff] }
  0x3a   : > { %v193_v13 = vmax.f32 %v185_v5, 1e-06  ;;  %v194_v14 = vmax.f32 %v186_v6, 1e-06  ;;  %v195_v15 = vmax.f32 %v187_v7, 1e-06  ;;  %v252_v21 = vunpack.c.l.s4 %v657_v20 }
  0x3b   : > { %v196_v17 = vmax.f32 %v188_v8, 1e-06  ;;  %v197_v18 = vmax.f32 %v189_v9, 1e-06  ;;  %v198_v19 = vmax.f32 %v190_v10, 1e-06  ;;  %v289_v51 = vunpack.c.l.bf16 %v481_v38 }
  0x3c   : > { %v199_v22 = vmax.f32 %v191_v11, 1e-06  ;;  %v200_v23 = vmax.f32 %v192_v12, 1e-06  ;;  %v202_v24 = vmul.f32 %v193_v13, %v193_v13  ;;  %v203_v25 = vmul.f32 %v194_v14, %v194_v14 }
  0x3d   : > { %v204_v26 = vmul.f32 %v195_v15, %v195_v15  ;;  %v205_v27 = vmul.f32 %v196_v17, %v196_v17  ;;  %v206_v28 = vmul.f32 %v197_v18, %v197_v18  ;;  %v207_v29 = vmul.f32 %v198_v19, %v198_v19 }
  0x3e   : > { %v208_v30 = vmul.f32 %v199_v22, %v199_v22  ;;  %v209_v31 = vmul.f32 %v200_v23, %v200_v23  ;;  %v210_v32 = vmul.f32 %v202_v24, %v193_v13  ;;  %v211_v33 = vmul.f32 %v203_v25, %v194_v14 }
  0x3f   : > { %v212_v34 = vmul.f32 %v204_v26, %v195_v15  ;;  %v213_v35 = vmul.f32 %v205_v27, %v196_v17  ;;  %v214_v36 = vmul.f32 %v206_v28, %v197_v18  ;;  %v215_v37 = vmul.f32 %v207_v29, %v198_v19 }
  0x40   : > { %v216_v39 = vmul.f32 %v208_v30, %v199_v22  ;;  %v217_v40 = vmul.f32 %v209_v31, %v200_v23  ;;  %v253_v41 = vunpack.c.0.s8 %v252_v21  ;;  %v255_v42 = vshrl.u32 %v254_v16, 7 }
  0x41   : > { %v218_v44 = vadd.f32 %v212_v34, %v210_v32  ;;  %v225_v45 = vadd.f32 %v213_v35, %v211_v33  ;;  %v290_v54 = vunpack.c.h.bf16 %v481_v38  ;;  %v291_v55 = vunpack.c.l.bf16 %v482_v43 }
  0x42   : > { %v232_v47 = vadd.f32 %v216_v39, %v214_v36  ;;  %v239_v48 = vadd.f32 %v217_v40, %v215_v37  ;;  %v760_v49 = vsub.s32 %v253_v41, %v255_v42  ;;  %v292_v58 = vunpack.c.h.bf16 %v482_v43 }
  0x43   : > { %v219_v52 = vrot.slane %v218_v44, 4  ;;  %v226_v53 = vrot.slane %v225_v45, 4  ;;  %v293_v59 = vunpack.c.l.bf16 %v483_v46  ;;  %v294_v62 = vunpack.c.h.bf16 %v483_v46 }
  0x44   : > { %v233_v56 = vrot.slane %v232_v47, 4  ;;  %v240_v57 = vrot.slane %v239_v48, 4  ;;  %v295_v63 = vunpack.c.l.bf16 %v484_v50  ;;  %v296_v2 = vunpack.c.h.bf16 %v484_v50 }
  0x45   : > { %v220_v60 = vadd.f32 %v219_v52, %v218_v44  ;;  %v227_v61 = vadd.f32 %v226_v53, %v225_v45  ;;  %v297_v3 = vmax.f32 %v289_v51, 1e-06  ;;  %v298_v6 = vmax.f32 %v290_v54, 1e-06 }
  0x46   : > { %v234_v0 = vadd.f32 %v233_v56, %v232_v47  ;;  %v241_v1 = vadd.f32 %v240_v57, %v239_v48  ;;  %v299_v7 = vmax.f32 %v291_v55, 1e-06  ;;  %v300_v10 = vmax.f32 %v292_v58, 1e-06 }
  0x47   : > { %v221_v4 = vrot.slane %v220_v60, 2  ;;  %v228_v5 = vrot.slane %v227_v61, 2  ;;  %v301_v11 = vmax.f32 %v293_v59, 1e-06  ;;  %v302_v14 = vmax.f32 %v294_v62, 1e-06 }
  0x48   : > { %v235_v8 = vrot.slane %v234_v0, 2  ;;  %v242_v9 = vrot.slane %v241_v1, 2  ;;  %v303_v15 = vmax.f32 %v295_v63, 1e-06  ;;  %v304_v18 = vmax.f32 %v296_v2, 1e-06 }
  0x49   : > { %v222_v12 = vadd.f32 %v221_v4, %v220_v60  ;;  %v229_v13 = vadd.f32 %v228_v5, %v227_v61  ;;  %v306_v19 = vmul.f32 %v297_v3, %v297_v3  ;;  %v307_v22 = vmul.f32 %v298_v6, %v298_v6  ;;  %v201_v61 = vld [vmem:[#allocation2] sm:$0xf] }
  0x4a   : > { %v236_v16 = vadd.f32 %v235_v8, %v234_v0  ;;  %v243_v17 = vadd.f32 %v242_v9, %v241_v1  ;;  %v308_v23 = vmul.f32 %v299_v7, %v299_v7  ;;  %v309_v26 = vmul.f32 %v300_v10, %v300_v10 }
  0x4b   : > { %v223_v20 = vrot.slane %v222_v12, 1  ;;  %v230_v21 = vrot.slane %v229_v13, 1  ;;  %v310_v27 = vmul.f32 %v301_v11, %v301_v11  ;;  %v311_v30 = vmul.f32 %v302_v14, %v302_v14 }
  0x4c   : > { %v237_v24 = vrot.slane %v236_v16, 1  ;;  %v244_v25 = vrot.slane %v243_v17, 1  ;;  %v312_v31 = vmul.f32 %v303_v15, %v303_v15  ;;  %v313_v34 = vmul.f32 %v304_v18, %v304_v18 }
  0x4d   : > { %v224_v28 = vadd.f32 %v223_v20, %v222_v12  ;;  %v231_v29 = vadd.f32 %v230_v21, %v229_v13  ;;  %v314_v35 = vmul.f32 %v306_v19, %v297_v3  ;;  %v315_v37 = vmul.f32 %v307_v22, %v298_v6 }
  0x4e   : > { %v238_v32 = vadd.f32 %v237_v24, %v236_v16  ;;  %v245_v33 = vadd.f32 %v244_v25, %v243_v17  ;;  %v316_v38 = vmul.f32 %v308_v23, %v299_v7  ;;  %v317_v39 = vmul.f32 %v309_v26, %v300_v10 }
  0x4f   : > { %v250_v36 = vcombine.low %v224_v28, %v231_v29  ;;  %v318_v41 = vmul.f32 %v310_v27, %v301_v11  ;;  %v319_v42 = vmul.f32 %v311_v30, %v302_v14  ;;  %v320_v43 = vmul.f32 %v312_v31, %v303_v15 }
  0x50   : > { %v258_v40 = vcombine.low %v238_v32, %v245_v33  ;;  %v321_v44 = vmul.f32 %v313_v34, %v304_v18  ;;  %v322_v45 = vadd.f32 %v316_v38, %v314_v35  ;;  %v329_v46 = vadd.f32 %v317_v39, %v315_v37 }
  0x51   : > { %v257_v47 = vrot.slane %v250_v36, %v760_v49  ;;  %v336_v50 = vadd.f32 %v320_v43, %v318_v41  ;;  %vm273_vm1 = vcmask 1043459   ;;  %vm275_vm2 = vcmask 1045509  }
  0x52   : > { %v265_v48 = vrot.slane %v258_v40, %v760_v49  ;;  %v323_v51 = vrot.slane %v322_v45, 4  ;;  %v330_v52 = vrot.slane %v329_v46, 4  ;;  %v343_v53 = vadd.f32 %v321_v44, %v319_v42 }
  0x53   : > { %v337_v55 = vrot.slane %v336_v50, 4  ;;  %vm277_vm3 = vcmask 1047559  }
  0x54   : > { %v270_v54 = vrot.slane %v265_v48, 7  ;;  %v324_v56 = vadd.f32 %v323_v51, %v322_v45  ;;  %v331_v57 = vadd.f32 %v330_v52, %v329_v46  ;;  %v344_v58 = vrot.slane %v343_v53, 4 }
  0x55   : > { %v338_v60 = vadd.f32 %v337_v55, %v336_v50 }
  0x56   : > { %v272_v59 = vsel %vm271_vm0, %v270_v54, %v257_v47  ;;  %v325_v63 = vrot.slane %v324_v56, 2  ;;  %v332_v0 = vrot.slane %v331_v57, 2  ;;  %v345_v1 = vadd.f32 %v344_v58, %v343_v53 }
  0x57   : > { %v274_v62 = vsel %vm273_vm1, %v270_v54, %v272_v59  ;;  %v339_v3 = vrot.slane %v338_v60, 2 }
  0x58   : > { %v276_v2 = vsel %vm275_vm2, %v270_v54, %v274_v62  ;;  %v326_v5 = vadd.f32 %v325_v63, %v324_v56  ;;  %v333_v6 = vadd.f32 %v332_v0, %v331_v57  ;;  %v346_v7 = vrot.slane %v345_v1, 2 }
  0x59   : > { %v278_v4 = vsel %vm277_vm3, %v270_v54, %v276_v2  ;;  %v340_v9 = vadd.f32 %v339_v3, %v338_v60 }
  0x5a   : > { %v280_v8 = vadd.f32 %v278_v4, %v201_v61  ;;  %v327_v10 = vrot.slane %v326_v5, 1  ;;  %v334_v11 = vrot.slane %v333_v6, 1  ;;  %v347_v12 = vadd.f32 %v346_v7, %v345_v1 }
  0x5b   : > { %v341_v13 = vrot.slane %v340_v9, 1 }
  0x5c   : > { %281 = vst [vmem:[#allocation2] sm:$0xf] %v280_v8  ;;  %v328_v14 = vadd.f32 %v327_v10, %v326_v5  ;;  %v335_v15 = vadd.f32 %v334_v11, %v333_v6  ;;  %v348_v16 = vrot.slane %v347_v12, 1 }
  0x5d   : > { %v342_v17 = vadd.f32 %v341_v13, %v340_v9 }
  0x5e   : > { %v349_v18 = vadd.f32 %v348_v16, %v347_v12  ;;  %v354_v19 = vcombine.low %v328_v14, %v335_v15 }
  0x60   : > { %v362_v20 = vcombine.low %v342_v17, %v349_v18  ;;  %v361_v21 = vrot.slane %v354_v19, %v760_v49 }
  0x62   : > { %v369_v22 = vrot.slane %v362_v20, %v760_v49 }
  0x63   : > { %v305_v25 = vld [vmem:[#allocation2] sm:$0xf] }
  0x64   : > { %v372_v23 = vrot.slane %v369_v22, 7 }
  0x66   : > { %v373_v24 = vsel %vm271_vm0, %v372_v23, %v361_v21  ;;  %383 = sbr.rel (%p485_p13) target bundleno = 147 (0x93), region = 36 }
  0x67   : > { %v374_v26 = vsel %vm273_vm1, %v372_v23, %v373_v24 }
  0x68   : > { %v375_v27 = vsel %vm275_vm2, %v372_v23, %v374_v26 }
  0x69   : > { %v376_v28 = vsel %vm277_vm3, %v372_v23, %v375_v27 }
  0x6a   : > { %v378_v29 = vadd.f32 %v376_v28, %v305_v25 }
  0x6c   : > { %379 = vst [vmem:[#allocation2] sm:$0xf] %v378_v29 }
  0x73   : > { %v384_v30 = vld [vmem:[#allocation2] sm:$0xf] }
  0x74   : > { %v386_v31 = vmul.f32 0.015625, %v384_v30 }
  0x76   : > { %564 = vlog2.f32 %v386_v31 }
  0x80   : > { %v565_v32 = vpop.eup %564 }
  0x81   : > { %v388_v49 = vmul.f32 0.6931472, %v565_v32 }
  0x83   : > { %v390_v33 = vmul.f32 0.33333334, %v388_v49 }
  0x85   : > { %v391_v34 = vmul.f32 1.442695, %v390_v33 }
  0x87   : > { %566 = vpow2.f32 %v391_v34 }
  0x91   : > { %v567_v35 = vpop.eup %566 }
  0x92   : > { %393 = vst [vmem:[#allocation6] sm:$0xf] %v567_v35 }
  0x93 PF: > { %p778_p0 = scmp.eq.s32.totalorder %s469_s12, 1  ;;  %s658_s9 = smov [#allocation6]  }
  0x94   : > { %s404_s17 = sshll.u32 %s658_s9, 4  ;;  %s405_s17 = int_to_ptr.vmem [resolvable:$true] %s404_s17 }
  0x95   : > { %s568_s19 = scalar_lea.vmem %s405_s17, 64  ;;  %p575_p4 = scmp.lt.s32.totalorder %s405_s17, %s405_s17 }
  0x96   : > { %p569_p1 = scmp.ne.s32.totalorder %s405_s17, %s568_s19  ;;  %p576_p5 = scmp.lt.s32.totalorder %s568_s19, %s568_s19 }
  0x98   : > { %p570_p2 = pnand %p569_p1, %p778_p0  ;;  %p577_p6 = por %p576_p5, %p575_p4 }
  0x9a   : > { %p571_p3 = pneg %p570_p2 }
  0x9c   : > { %p578_p7 = pnand %p577_p6, %p571_p3 }
  0x9e   : > { %581 = shalt.err (!%p578_p7)
}
  0x9f   : > { %s582_s12 = scalar_lea.hbm %s823_s1, 64 }
  0xa0   : > { %p583_p8 = scmp.ne.s32.totalorder %s823_s1, %s582_s12  ;;  %p588_p11 = scmp.lt.u32.totalorder %s582_s12, %s823_s1 }
  0xa2   : > { %p584_p9 = pnand %p583_p8, %p778_p0 }
  0xa4   : > { %p585_p10 = pneg %p584_p9 }
  0xa6   : > { %p590_p12 = pnand %p588_p11, %p585_p10 }
  0xa8   : > { %593 = shalt.err (!%p590_p12)
}
  0xa9   : > { %502 = dma.vmem_to_hbm [thread:$0]  (%p778_p0), %s405_s17, 64, %s823_s1, [#allocation5]  }
  0xaa   : > { %623 = dma.done.wait (%p778_p0), [#allocation5], 64  }
  0xab   : > { %625 = vsyncadd (%p778_p0), [#allocation5], 4294967232 }
  0xac PF: > { %s15_s11 = sadd.s32 1, %s648_s11   ;;  %s827_s6 = smov %s632_s7 }
  0xad   : > { %p12_p13 = scmp.ge.s32.totalorder %s15_s11, 4   ;;  %s828_s7 = smov %s636_s8 }
  0xae   : > { %s829_s8 = smov %s719_s18  ;;  %s830_s9 = smov %s644_s10 }
  0xaf   : > { %s831_s10 = smov %s833_s13  ;;  %14 = sbr.rel (!%p12_p13) target bundleno = 5 (0x5), region = 77 }
  0xb6   :  { %417 = vsyncpa [#allocation4], 1 }
  0xb7   :  { %419 = vsyncpa [#allocation4 + $0x1], 1 }
  0xb8   :  { %420 = vsyncpa [#allocation5], 1 }
  0xb9   :  { %422 = vsyncpa [#allocation5 + $0x1], 1 }

</bundles_post_ra>
